<compile_context>
chip_gen: v5e
topology: v5e:2x2
jax: 0.10.0
libtpu: 0.0.40
codegen_flags: <defaults>
</compile_context>

<pallas_src>
import jax
import jax.numpy as jnp
from jax.experimental import pallas as pl
from jax.experimental.pallas import tpu as pltpu

IN_DIM = 28 * 28      # 784
HID = 64
OUT_DIM = 10


def mlp_kernel(x_ref,
               w1_ref, b1_ref,
               w2_ref, b2_ref,
               w3_ref, b3_ref,
               w4_ref, b4_ref,
               o_ref):
    # Whole forward pass fused: 3x (matmul + bias + relu), final matmul + bias,
    # then log_softmax along the class axis.  Matmul operands are bf16 (cast
    # here, in-kernel), all accumulation and the softmax path are f32.
    x = x_ref[...].astype(jnp.bfloat16)                      # (tile, 784)

    h = jnp.dot(x, w1_ref[...], preferred_element_type=jnp.float32) + b1_ref[...]
    h = jnp.maximum(h, 0.0)

    h = jnp.dot(h.astype(jnp.bfloat16), w2_ref[...],
                preferred_element_type=jnp.float32) + b2_ref[...]
    h = jnp.maximum(h, 0.0)

    h = jnp.dot(h.astype(jnp.bfloat16), w3_ref[...],
                preferred_element_type=jnp.float32) + b3_ref[...]
    h = jnp.maximum(h, 0.0)

    logits = jnp.dot(h.astype(jnp.bfloat16), w4_ref[...],
                     preferred_element_type=jnp.float32) + b4_ref[...]

    # log_softmax over dim=1 (last axis here), f32.
    m = jnp.max(logits, axis=-1, keepdims=True)
    shifted = logits - m
    lse = jnp.log(jnp.sum(jnp.exp(shifted), axis=-1, keepdims=True))
    o_ref[...] = (shifted - lse).astype(o_ref.dtype)


def _round_up(x, m):
    return ((x + m - 1) // m) * m


def _choose_tile(B, batch_tile):
    """Pick a batch tile: >=2 grid steps when possible (v7x has 2 TCs),
    16-row multiples (bf16 sublane packing), capped at batch_tile."""
    if B <= 16:
        return B
    tile = min(batch_tile, _round_up(pl.cdiv(B, 2), 16))
    # Prefer 256-row multiples once the tile is large (MXU rows), but only
    # when that does not blow up the ragged-tail padding.
    if tile >= 512:
        tile = (tile // 256) * 256
    return min(tile, _round_up(B, 16))


def prepare_params(params):
    """One-time conversion: weights -> bf16 (in, out), biases -> f32 (1, N).
    Do this once (e.g. after init), NOT on every forward call."""
    return tuple((jnp.asarray(w, jnp.bfloat16),
                  jnp.asarray(b, jnp.float32).reshape(1, -1))
                 for (w, b) in params)


def net_forward(x, prepped_params, *, batch_tile=1024):
    """x: (B, 784) float32. prepped_params: output of prepare_params().
    Returns log-probabilities (B, 10) float32."""
    B = x.shape[0]
    (w1, b1), (w2, b2), (w3, b3), (w4, b4) = prepped_params

    # ---- batch tiling ---------------------------------------------------------
    tile = _choose_tile(B, batch_tile)
    grid_len = pl.cdiv(B, tile)
    B_pad = grid_len * tile
    x_in = x if B_pad == B else jnp.pad(x, ((0, B_pad - B), (0, 0)))

    # ---- cost estimate (helps XLA schedule around the custom call) ------------
    weight_elems = IN_DIM * HID + 2 * HID * HID + HID * OUT_DIM
    flops = 2 * B_pad * weight_elems
    transcendentals = B_pad * (OUT_DIM + 1)            # exp per class + log per row
    bytes_accessed = (B_pad * IN_DIM * 4               # x (f32, straight from HBM)
                      + B_pad * OUT_DIM * 4            # output (f32)
                      + weight_elems * 2               # weights (bf16, resident)
                      + (3 * HID + OUT_DIM) * 4)       # biases (f32)
    cost = pl.CostEstimate(flops=flops, transcendentals=transcendentals,
                           bytes_accessed=bytes_accessed)

    # ---- VMEM budget: double-buffered f32 x + out, resident weights, headroom -
    io_bytes = 2 * tile * IN_DIM * 4 + 2 * tile * OUT_DIM * 4
    w_bytes = 2 * (weight_elems * 2 + (3 * HID + OUT_DIM) * 4)
    vmem_limit = int(min(max(io_bytes + w_bytes + (8 << 20), 24 << 20), 48 << 20))

    def full_spec(shape):
        # Grid-invariant block: DMA'd once, stays resident in VMEM across steps.
        return pl.BlockSpec(shape, lambda i: (0, 0))

    out = pl.pallas_call(
        mlp_kernel,
        out_shape=jax.ShapeDtypeStruct((B_pad, OUT_DIM), jnp.float32),
        grid_spec=pltpu.PrefetchScalarGridSpec(
            num_scalar_prefetch=0,
            grid=(grid_len,),
            in_specs=[
                pl.BlockSpec((tile, IN_DIM), lambda i: (i, 0)),
                full_spec(w1.shape), full_spec(b1.shape),
                full_spec(w2.shape), full_spec(b2.shape),
                full_spec(w3.shape), full_spec(b3.shape),
                full_spec(w4.shape), full_spec(b4.shape),
            ],
            out_specs=pl.BlockSpec((tile, OUT_DIM), lambda i: (i, 0)),
        ),
        compiler_params=pltpu.CompilerParams(
            dimension_semantics=("parallel",),
            vmem_limit_bytes=vmem_limit,
        ),
        cost_estimate=cost,
    )(x_in, w1, b1, w2, b2, w3, b3, w4, b4)

    return out if B_pad == B else out[:B]


def init_params(key):
    """Deterministic init mirroring nn.Linear's uniform(-1/sqrt(fan_in), +)."""
    dims = [(IN_DIM, HID), (HID, HID), (HID, HID), (HID, OUT_DIM)]
    params = []
    for (fan_in, fan_out) in dims:
        key, kw, kb = jax.random.split(key, 3)
        bound = 1.0 / jnp.sqrt(fan_in)
        # stored as (in, out) so kernel does x @ W
        w = jax.random.uniform(kw, (fan_in, fan_out), jnp.float32, -bound, bound)
        b = jax.random.uniform(kb, (fan_out,), jnp.float32, -bound, bound)
        params.append((w, b))
    return params


def reference_forward(x, params):
    (w1, b1), (w2, b2), (w3, b3), (w4, b4) = params
    h = jax.nn.relu(x @ w1 + b1)
    h = jax.nn.relu(h @ w2 + b2)
    h = jax.nn.relu(h @ w3 + b3)
    logits = h @ w4 + b4
    return jax.nn.log_softmax(logits, axis=1)


if __name__ == "__main__":
    key = jax.random.PRNGKey(0)
    kx, kp = jax.random.split(key)
    B = 32                          # small test batch -> tile 16, grid of 2
    x = jax.random.normal(kx, (B, IN_DIM), dtype=jnp.float32)
    params = init_params(kp)
    prepped = prepare_params(params)    # one-time weight/bias conversion

    out = net_forward(x, prepped)
    out = jax.block_until_ready(out)

    ref = reference_forward(x, params)
    assert out.shape == (B, OUT_DIM)
    # Looser tolerance: kernel runs the matmuls in bf16 (f32 accumulation).
    assert jnp.allclose(out, ref, atol=5e-2, rtol=1e-3), "mismatch vs reference"
    # Rows of log-probabilities must exp-sum to 1.
    assert jnp.allclose(jnp.sum(jnp.exp(out), axis=-1), 1.0, atol=1e-3)

    print("KERNEL_OK")
</pallas_src>

<mosaic_0001>
module attributes {stable_mosaic.version = 11 : i64} {
  func.func @mlp_kernel(%arg0: i32, %arg1: memref<16x784xf32, #tpu.memory_space<vmem>>, %arg2: memref<784x64xbf16, #tpu.memory_space<vmem>>, %arg3: memref<1x64xf32, #tpu.memory_space<vmem>>, %arg4: memref<64x64xbf16, #tpu.memory_space<vmem>>, %arg5: memref<1x64xf32, #tpu.memory_space<vmem>>, %arg6: memref<64x64xbf16, #tpu.memory_space<vmem>>, %arg7: memref<1x64xf32, #tpu.memory_space<vmem>>, %arg8: memref<64x10xbf16, #tpu.memory_space<vmem>>, %arg9: memref<1x10xf32, #tpu.memory_space<vmem>>, %arg10: memref<16x10xf32, #tpu.memory_space<vmem>>) attributes {dimension_semantics = [#tpu.dimension_semantics<parallel>], iteration_bounds = array<i64: 2>, scalar_prefetch = 0 : i64, scratch_operands = 0 : i64, tpu.core_type = #tpu.core_type<tc>, window_params = [{transform_indices = @transform_0, window_bounds = array<i64: 16, 784>}, {pipeline_mode = #tpu.pipeline_mode<synchronous>, transform_indices = @transform_1, window_bounds = array<i64: 784, 64>}, {pipeline_mode = #tpu.pipeline_mode<synchronous>, transform_indices = @transform_2, window_bounds = array<i64: 1, 64>}, {pipeline_mode = #tpu.pipeline_mode<synchronous>, transform_indices = @transform_3, window_bounds = array<i64: 64, 64>}, {pipeline_mode = #tpu.pipeline_mode<synchronous>, transform_indices = @transform_4, window_bounds = array<i64: 1, 64>}, {pipeline_mode = #tpu.pipeline_mode<synchronous>, transform_indices = @transform_5, window_bounds = array<i64: 64, 64>}, {pipeline_mode = #tpu.pipeline_mode<synchronous>, transform_indices = @transform_6, window_bounds = array<i64: 1, 64>}, {pipeline_mode = #tpu.pipeline_mode<synchronous>, transform_indices = @transform_7, window_bounds = array<i64: 64, 10>}, {pipeline_mode = #tpu.pipeline_mode<synchronous>, transform_indices = @transform_8, window_bounds = array<i64: 1, 10>}, {transform_indices = @transform_9, window_bounds = array<i64: 16, 10>}]} {
    %c0 = arith.constant 0 : index
    %c0_0 = arith.constant 0 : index
    %0 = vector.load %arg1[%c0, %c0_0] : memref<16x784xf32, #tpu.memory_space<vmem>>, vector<16x784xf32>
    %1 = arith.truncf %0 : vector<16x784xf32> to vector<16x784xbf16>
    %c0_1 = arith.constant 0 : index
    %c0_2 = arith.constant 0 : index
    %2 = vector.load %arg2[%c0_1, %c0_2] : memref<784x64xbf16, #tpu.memory_space<vmem>>, vector<784x64xbf16>
    %cst = arith.constant dense<0.000000e+00> : vector<16x64xf32>
    %3 = tpu.matmul %1, %2, %cst {dimension_numbers = #tpu.dot_dimension_numbers<[1], [0], [0], [1], [0, 0, 1, 1], [], []>} : vector<16x784xbf16>, vector<784x64xbf16>, vector<16x64xf32> -> vector<16x64xf32>
    %c0_3 = arith.constant 0 : index
    %c0_4 = arith.constant 0 : index
    %4 = vector.load %arg3[%c0_3, %c0_4] : memref<1x64xf32, #tpu.memory_space<vmem>>, vector<1x64xf32>
    %5 = vector.broadcast %4 : vector<1x64xf32> to vector<16x64xf32>
    %6 = arith.addf %3, %5 : vector<16x64xf32>
    %cst_5 = arith.constant 0.000000e+00 : f32
    %7 = vector.broadcast %cst_5 : f32 to vector<16x64xf32>
    %8 = arith.maximumf %6, %7 : vector<16x64xf32>
    %9 = arith.truncf %8 : vector<16x64xf32> to vector<16x64xbf16>
    %c0_6 = arith.constant 0 : index
    %c0_7 = arith.constant 0 : index
    %10 = vector.load %arg4[%c0_6, %c0_7] : memref<64x64xbf16, #tpu.memory_space<vmem>>, vector<64x64xbf16>
    %cst_8 = arith.constant dense<0.000000e+00> : vector<16x64xf32>
    %11 = tpu.matmul %9, %10, %cst_8 {dimension_numbers = #tpu.dot_dimension_numbers<[1], [0], [0], [1], [0, 0, 1, 1], [], []>} : vector<16x64xbf16>, vector<64x64xbf16>, vector<16x64xf32> -> vector<16x64xf32>
    %c0_9 = arith.constant 0 : index
    %c0_10 = arith.constant 0 : index
    %12 = vector.load %arg5[%c0_9, %c0_10] : memref<1x64xf32, #tpu.memory_space<vmem>>, vector<1x64xf32>
    %13 = vector.broadcast %12 : vector<1x64xf32> to vector<16x64xf32>
    %14 = arith.addf %11, %13 : vector<16x64xf32>
    %cst_11 = arith.constant 0.000000e+00 : f32
    %15 = vector.broadcast %cst_11 : f32 to vector<16x64xf32>
    %16 = arith.maximumf %14, %15 : vector<16x64xf32>
    %17 = arith.truncf %16 : vector<16x64xf32> to vector<16x64xbf16>
    %c0_12 = arith.constant 0 : index
    %c0_13 = arith.constant 0 : index
    %18 = vector.load %arg6[%c0_12, %c0_13] : memref<64x64xbf16, #tpu.memory_space<vmem>>, vector<64x64xbf16>
    %cst_14 = arith.constant dense<0.000000e+00> : vector<16x64xf32>
    %19 = tpu.matmul %17, %18, %cst_14 {dimension_numbers = #tpu.dot_dimension_numbers<[1], [0], [0], [1], [0, 0, 1, 1], [], []>} : vector<16x64xbf16>, vector<64x64xbf16>, vector<16x64xf32> -> vector<16x64xf32>
    %c0_15 = arith.constant 0 : index
    %c0_16 = arith.constant 0 : index
    %20 = vector.load %arg7[%c0_15, %c0_16] : memref<1x64xf32, #tpu.memory_space<vmem>>, vector<1x64xf32>
    %21 = vector.broadcast %20 : vector<1x64xf32> to vector<16x64xf32>
    %22 = arith.addf %19, %21 : vector<16x64xf32>
    %cst_17 = arith.constant 0.000000e+00 : f32
    %23 = vector.broadcast %cst_17 : f32 to vector<16x64xf32>
    %24 = arith.maximumf %22, %23 : vector<16x64xf32>
    %25 = arith.truncf %24 : vector<16x64xf32> to vector<16x64xbf16>
    %c0_18 = arith.constant 0 : index
    %c0_19 = arith.constant 0 : index
    %26 = vector.load %arg8[%c0_18, %c0_19] : memref<64x10xbf16, #tpu.memory_space<vmem>>, vector<64x10xbf16>
    %cst_20 = arith.constant dense<0.000000e+00> : vector<16x10xf32>
    %27 = tpu.matmul %25, %26, %cst_20 {dimension_numbers = #tpu.dot_dimension_numbers<[1], [0], [0], [1], [0, 0, 1, 1], [], []>} : vector<16x64xbf16>, vector<64x10xbf16>, vector<16x10xf32> -> vector<16x10xf32>
    %c0_21 = arith.constant 0 : index
    %c0_22 = arith.constant 0 : index
    %28 = vector.load %arg9[%c0_21, %c0_22] : memref<1x10xf32, #tpu.memory_space<vmem>>, vector<1x10xf32>
    %29 = vector.broadcast %28 : vector<1x10xf32> to vector<16x10xf32>
    %30 = arith.addf %27, %29 : vector<16x10xf32>
    %cst_23 = arith.constant dense<0xFF800000> : vector<16xf32>
    %31 = vector.multi_reduction <maximumf>, %30, %cst_23 [1] : vector<16x10xf32> to vector<16xf32>
    %32 = vector.shape_cast %31 : vector<16xf32> to vector<16x1xf32>
    %33 = vector.broadcast %32 : vector<16x1xf32> to vector<16x10xf32>
    %34 = arith.subf %30, %33 : vector<16x10xf32>
    %35 = math.exp %34 : vector<16x10xf32>
    %cst_24 = arith.constant dense<0.000000e+00> : vector<16xf32>
    %36 = vector.multi_reduction <add>, %35, %cst_24 [1] : vector<16x10xf32> to vector<16xf32>
    %37 = vector.shape_cast %36 : vector<16xf32> to vector<16x1xf32>
    %38 = math.log %37 : vector<16x1xf32>
    %39 = vector.broadcast %38 : vector<16x1xf32> to vector<16x10xf32>
    %40 = arith.subf %34, %39 : vector<16x10xf32>
    %c0_25 = arith.constant 0 : index
    %c0_26 = arith.constant 0 : index
    %41 = vector.load %arg10[%c0_25, %c0_26] : memref<16x10xf32, #tpu.memory_space<vmem>>, vector<16x10xf32>
    tpu.vector_store %arg10[%c0_25, %c0_26], %40 {strides = array<i32>} : memref<16x10xf32, #tpu.memory_space<vmem>>, vector<16x10xf32>,
    return
  }
  func.func @transform_0(%arg0: i32) -> (i32, i32) {
    %c0_i32 = arith.constant 0 : i32
    %c0_i32_0 = arith.constant 0 : i32
    return %arg0, %c0_i32 : i32, i32
  }
  func.func @transform_1(%arg0: i32) -> (i32, i32) {
    %c0_i32 = arith.constant 0 : i32
    %c0_i32_0 = arith.constant 0 : i32
    %c0_i32_1 = arith.constant 0 : i32
    return %c0_i32, %c0_i32_0 : i32, i32
  }
  func.func @transform_2(%arg0: i32) -> (i32, i32) {
    %c0_i32 = arith.constant 0 : i32
    %c0_i32_0 = arith.constant 0 : i32
    %c0_i32_1 = arith.constant 0 : i32
    return %c0_i32, %c0_i32_0 : i32, i32
  }
  func.func @transform_3(%arg0: i32) -> (i32, i32) {
    %c0_i32 = arith.constant 0 : i32
    %c0_i32_0 = arith.constant 0 : i32
    %c0_i32_1 = arith.constant 0 : i32
    return %c0_i32, %c0_i32_0 : i32, i32
  }
  func.func @transform_4(%arg0: i32) -> (i32, i32) {
    %c0_i32 = arith.constant 0 : i32
    %c0_i32_0 = arith.constant 0 : i32
    %c0_i32_1 = arith.constant 0 : i32
    return %c0_i32, %c0_i32_0 : i32, i32
  }
  func.func @transform_5(%arg0: i32) -> (i32, i32) {
    %c0_i32 = arith.constant 0 : i32
    %c0_i32_0 = arith.constant 0 : i32
    %c0_i32_1 = arith.constant 0 : i32
    return %c0_i32, %c0_i32_0 : i32, i32
  }
  func.func @transform_6(%arg0: i32) -> (i32, i32) {
    %c0_i32 = arith.constant 0 : i32
    %c0_i32_0 = arith.constant 0 : i32
    %c0_i32_1 = arith.constant 0 : i32
    return %c0_i32, %c0_i32_0 : i32, i32
  }
  func.func @transform_7(%arg0: i32) -> (i32, i32) {
    %c0_i32 = arith.constant 0 : i32
    %c0_i32_0 = arith.constant 0 : i32
    %c0_i32_1 = arith.constant 0 : i32
    return %c0_i32, %c0_i32_0 : i32, i32
  }
  func.func @transform_8(%arg0: i32) -> (i32, i32) {
    %c0_i32 = arith.constant 0 : i32
    %c0_i32_0 = arith.constant 0 : i32
    %c0_i32_1 = arith.constant 0 : i32
    return %c0_i32, %c0_i32_0 : i32, i32
  }
  func.func @transform_9(%arg0: i32) -> (i32, i32) {
    %c0_i32 = arith.constant 0 : i32
    %c0_i32_0 = arith.constant 0 : i32
    return %arg0, %c0_i32 : i32, i32
  }
}

</mosaic_0001>

<bundles_post_ra>
// kernel: tpu_custom_call.1
= control target key start
LH: loop header
LB: loop body
LE: loop exit
PB: predicated region body
PF: predicated region fallthrough
CT: control target
= control target key end

     0   :  { %s1510_s30 = smov 0   ;;  %s1751_s0 = inlined_call_operand.vmem [shape: f32[32,784], index: 0, kind: input, shape index: {}]   ;;  %s1752_s1 = inlined_call_operand.vmem [shape: bf16[784,64], index: 1, kind: input, shape index: {}]   ;;  %s1753_s2 = inlined_call_operand.vmem [shape: f32[1,64], index: 2, kind: input, shape index: {}]   ;;  %s1754_s3 = inlined_call_operand.vmem [shape: bf16[64,64], index: 3, kind: input, shape index: {}]   ;;  %s1755_s4 = inlined_call_operand.vmem [shape: f32[1,64], index: 4, kind: input, shape index: {}]   ;;  %s1756_s5 = inlined_call_operand.vmem [shape: bf16[64,64], index: 5, kind: input, shape index: {}]   ;;  %s1757_s6 = inlined_call_operand.vmem [shape: f32[1,64], index: 6, kind: input, shape index: {}]   ;;  %s1758_s7 = inlined_call_operand.vmem [shape: bf16[64,10], index: 7, kind: input, shape index: {}]   ;;  %s1759_s8 = inlined_call_operand.vmem [shape: f32[1,10], index: 8, kind: input, shape index: {}]   ;;  %s1760_s9 = inlined_call_operand.vmem [shape: f32[32,10], index: 9, kind: output, shape index: {}]  }
   0x1 LB: > { %s1111_s10 = sadd.s32 4294967295, %s1458_s30   ;;  %p1115_p0 = scmp.ge.s32.totalorder %s1458_s30, 1  ;;  %s1458_s30 = sphi %s1510_s30, %s19_s30  }
   0x2   : > { %p289_p1 = scmp.lt.s32.totalorder %s1458_s30, 3 }
   0x4   : > { %p290_p2 = pnand %p1115_p0, %p289_p1 }
   0x5   : > { %s1116_s16 = sshll.u32 (!%p290_p2), %s1111_s10, 1 }
   0x6   : > { %293 = sbr.rel (%p290_p2) target bundleno = 910 (0x38e), region = 56  ;;  %p327_p3 = scmp.lt.s32.totalorder (!%p290_p2), %s1116_s16, 3 }
   0xb   : > { %v1377_v0 = vld [vmem:[%s1752_s1 + $0x38] sm:$0xff]  ;;  %v1376_v4 = vld [vmem:[%s1752_s1 + $0x30] sm:$0xff]  ;;  %v1375_v8 = vld [vmem:[%s1752_s1 + $0x28] sm:$0xff]  ;;  %s1762_s16 = smov (!%p327_p3, %s1116_s16), 3  ;;  %vm757_vm0 = vcmask 130048   ;;  %vm898_vm1 = vcmask 523264  }
   0xc   : > { %v1385_v1 = vld [vmem:[%s1752_s1 + $0x78] sm:$0xff]  ;;  %761 = vmatpush.bf16.msra.mxu0 %v1377_v0  ;;  %v1384_v5 = vld [vmem:[%s1752_s1 + $0x70] sm:$0xff]  ;;  %v1383_v9 = vld [vmem:[%s1752_s1 + $0x68] sm:$0xff]  ;;  %s1431_s22 = smul.u32 56, %s1762_s16  ;;  %vm1028_vm2 = vcmask 80896   ;;  %s1119_s14 = sshll.u32 %s1762_s16, 3 }
   0xd   : > { %v1393_v2 = vld [vmem:[%s1752_s1 + $0xb8] sm:$0xff]  ;;  %775 = vmatpush.bf16.msra.mxu1 %v1385_v1  ;;  %v1392_v6 = vld [vmem:[%s1752_s1 + $0xb0] sm:$0xff]  ;;  %v1391_v10 = vld [vmem:[%s1752_s1 + $0xa8] sm:$0xff]  ;;  %s337_s18 = scalar_lea.vmem %s1760_s9, %s1119_s14 }
   0xe   : > { %v1401_v3 = vld [vmem:[%s1752_s1 + $0xf8] sm:$0xff]  ;;  %789 = vmatpush.bf16.msra.mxu2 %v1393_v2  ;;  %v1400_v7 = vld [vmem:[%s1752_s1 + $0xf0] sm:$0xff]  ;;  %v1399_v11 = vld [vmem:[%s1752_s1 + $0xe8] sm:$0xff]  ;;  %s1608_s13 = scalar_lea.vmem %s1751_s0, %s1431_s22 }
   0xf   : > { %803 = vmatpush.bf16.msra.mxu3 %v1401_v3  ;;  %v1374_v12 = vld [vmem:[%s1752_s1 + $0x20] sm:$0xff]  ;;  %v1373_v16 = vld [vmem:[%s1752_s1 + $0x18] sm:$0xff]  ;;  %v1372_v20 = vld [vmem:[%s1752_s1 + $0x10] sm:$0xff] }
  0x10   : > { %762 = vmatpush.bf16.msra.mxu0 %v1376_v4  ;;  %v1382_v13 = vld [vmem:[%s1752_s1 + $0x60] sm:$0xff]  ;;  %v1381_v17 = vld [vmem:[%s1752_s1 + $0x58] sm:$0xff]  ;;  %v1380_v21 = vld [vmem:[%s1752_s1 + $0x50] sm:$0xff] }
  0x11   : > { %776 = vmatpush.bf16.msra.mxu1 %v1384_v5  ;;  %v1390_v14 = vld [vmem:[%s1752_s1 + $0xa0] sm:$0xff]  ;;  %v1389_v18 = vld [vmem:[%s1752_s1 + $0x98] sm:$0xff]  ;;  %v1388_v22 = vld [vmem:[%s1752_s1 + $0x90] sm:$0xff] }
  0x12   : > { %790 = vmatpush.bf16.msra.mxu2 %v1392_v6  ;;  %v1398_v15 = vld [vmem:[%s1752_s1 + $0xe0] sm:$0xff]  ;;  %v1397_v19 = vld [vmem:[%s1752_s1 + $0xd8] sm:$0xff]  ;;  %v1396_v23 = vld [vmem:[%s1752_s1 + $0xd0] sm:$0xff] }
  0x13   : > { %804 = vmatpush.bf16.msra.mxu3 %v1400_v7  ;;  %v1371_v24 = vld [vmem:[%s1752_s1 + $0x8] sm:$0xff]  ;;  %v1370_v28 = vld [vmem:[%s1752_s1] sm:$0xff]  ;;  %v347_v31 = vld [vmem:[%s1608_s13 + $0x38] sm:$0xff] }
  0x14   : > { %763 = vmatpush.bf16.msra.mxu0 %v1375_v8  ;;  %v1379_v25 = vld [vmem:[%s1752_s1 + $0x48] sm:$0xff]  ;;  %v1378_v29 = vld [vmem:[%s1752_s1 + $0x40] sm:$0xff]  ;;  %v1409_v34 = vld [vmem:[%s1752_s1 + $0x138] sm:$0xff] }
  0x15   : > { %777 = vmatpush.bf16.msra.mxu1 %v1383_v9  ;;  %v1387_v26 = vld [vmem:[%s1752_s1 + $0x88] sm:$0xff]  ;;  %v340_v30 = vld [vmem:[%s1608_s13] sm:$0xff]  ;;  %v1417_v35 = vld [vmem:[%s1752_s1 + $0x178] sm:$0xff] }
  0x16   : > { %791 = vmatpush.bf16.msra.mxu2 %v1391_v10  ;;  %v1395_v27 = vld [vmem:[%s1752_s1 + $0xc8] sm:$0xff]  ;;  %v348_v33 = vld [vmem:[%s1608_s13 + $0x40] sm:$0xff]  ;;  %v342_v38 = vld [vmem:[%s1608_s13 + $0x10] sm:$0xff]  ;;  %v354_v40 = vpack.c.bf16 %v347_v31, %v340_v30 }
  0x17   : > { %805 = vmatpush.bf16.msra.mxu3 %v1399_v11  ;;  %v341_v32 = vld [vmem:[%s1608_s13 + $0x8] sm:$0xff]  ;;  %v1386_v36 = vld [vmem:[%s1752_s1 + $0x80] sm:$0xff]  ;;  %v343_v41 = vld [vmem:[%s1608_s13 + $0x18] sm:$0xff] }
  0x18   : > { %764 = vmatpush.bf16.msra.mxu0 %v1374_v12  ;;  %v1394_v37 = vld [vmem:[%s1752_s1 + $0xc0] sm:$0xff]  ;;  %v349_v39 = vld [vmem:[%s1608_s13 + $0x48] sm:$0xff]  ;;  %v350_v42 = vld [vmem:[%s1608_s13 + $0x50] sm:$0xff]  ;;  %v355_v43 = vpack.c.bf16 %v348_v33, %v341_v32 }
  0x19   : > { %778 = vmatpush.bf16.msra.mxu1 %v1382_v13  ;;  %v1418_v44 = vld [vmem:[%s1752_s1 + $0x180] sm:$0xff]  ;;  %v1408_v45 = vld [vmem:[%s1752_s1 + $0x130] sm:$0xff]  ;;  %v356_v47 = vpack.c.bf16 %v349_v39, %v342_v38  ;;  %v357_v48 = vpack.c.bf16 %v350_v42, %v343_v41  ;;  %v1407_v49 = vld [vmem:[%s1752_s1 + $0x128] sm:$0xff] }
  0x1a   : > { %792 = vmatpush.bf16.msra.mxu2 %v1390_v14  ;;  %v1416_v46 = vld [vmem:[%s1752_s1 + $0x170] sm:$0xff]  ;;  %v1415_v50 = vld [vmem:[%s1752_s1 + $0x168] sm:$0xff]  ;;  %v1406_v51 = vld [vmem:[%s1752_s1 + $0x120] sm:$0xff] }
  0x1b   : > { %806 = vmatpush.bf16.msra.mxu3 %v1398_v15  ;;  %v1414_v52 = vld [vmem:[%s1752_s1 + $0x160] sm:$0xff]  ;;  %v1405_v53 = vld [vmem:[%s1752_s1 + $0x118] sm:$0xff]  ;;  %v346_v55 = vld [vmem:[%s1608_s13 + $0x30] sm:$0xff] }
  0x1c   : > { %765 = vmatpush.bf16.msra.mxu0 %v1373_v16  ;;  %v1413_v54 = vld [vmem:[%s1752_s1 + $0x158] sm:$0xff]  ;;  %v353_v56 = vld [vmem:[%s1608_s13 + $0x68] sm:$0xff]  ;;  %v1404_v57 = vld [vmem:[%s1752_s1 + $0x110] sm:$0xff] }
  0x1d   : > { %779 = vmatpush.bf16.msra.mxu1 %v1381_v17  ;;  %v1412_v58 = vld [vmem:[%s1752_s1 + $0x150] sm:$0xff]  ;;  %v360_v59 = vpack.c.bf16 %v353_v56, %v346_v55  ;;  %v1403_v60 = vld [vmem:[%s1752_s1 + $0x108] sm:$0xff]  ;;  %v1402_v62 = vld [vmem:[%s1752_s1 + $0x100] sm:$0xff] }
  0x1e   : > { %793 = vmatpush.bf16.msra.mxu2 %v1389_v18  ;;  %v1411_v61 = vld [vmem:[%s1752_s1 + $0x148] sm:$0xff]  ;;  %v1410_v63 = vld [vmem:[%s1752_s1 + $0x140] sm:$0xff]  ;;  %v351_v1 = vld [vmem:[%s1608_s13 + $0x58] sm:$0xff] }
  0x1f   : > { %807 = vmatpush.bf16.msra.mxu3 %v1397_v19  ;;  %v344_v0 = vld [vmem:[%s1608_s13 + $0x20] sm:$0xff]  ;;  %v345_v2 = vld [vmem:[%s1608_s13 + $0x28] sm:$0xff]  ;;  %v1422_v6 = vld [vmem:[%s1754_s3 + $0x18] sm:$0xff] }
  0x20   : > { %766 = vmatpush.bf16.msra.mxu0 %v1372_v20  ;;  %v352_v3 = vld [vmem:[%s1608_s13 + $0x60] sm:$0xff]  ;;  %v358_v4 = vpack.c.bf16 %v351_v1, %v344_v0  ;;  %v1421_v7 = vld [vmem:[%s1754_s3 + $0x10] sm:$0xff]  ;;  %v1420_v8 = vld [vmem:[%s1754_s3 + $0x8] sm:$0xff] }
  0x21   : > { %780 = vmatpush.bf16.msra.mxu1 %v1380_v21  ;;  %v359_v5 = vpack.c.bf16 %v352_v3, %v345_v2  ;;  %v1419_v12 = vld [vmem:[%s1754_s3] sm:$0xff]  ;;  %v1426_v14 = vld [vmem:[%s1756_s5 + $0x18] sm:$0xff]  ;;  %v1429_v55 = vld [vmem:[%s1758_s7 + $0x10] sm:$0xff] }
  0x22   : > { %794 = vmatpush.bf16.msra.mxu2 %v1388_v22  ;;  %v1440_v13 = vld [vmem:[%s1753_s2] ss:$0 sm:$0xff]  ;;  %v1428_v56 = vld [vmem:[%s1758_s7 + $0x8] sm:$0xff] }
  0x23   : > { %808 = vmatpush.bf16.msra.mxu3 %v1396_v23  ;;  %v1443_v2 = vld [vmem:[%s1759_s8] ss:$0 sm:$0xff] }
  0x24   : > { %767 = vmatpush.bf16.msra.mxu0 %v1371_v24 }
  0x25   : > { %781 = vmatpush.bf16.msra.mxu1 %v1379_v25 }
  0x26   : > { %795 = vmatpush.bf16.msra.mxu2 %v1387_v26 }
  0x27   : > { %809 = vmatpush.bf16.msra.mxu3 %v1395_v27 }
  0x28   : > { %768 = vmatpush.bf16.msra.mxu0 %v1370_v28 }
  0x29   : > { %782 = vmatpush.bf16.msra.mxu1 %v1378_v29 }
  0x2a   : > { %796 = vmatpush.bf16.msra.mxu2 %v1386_v36 }
  0x2b   : > { %810 = vmatpush.bf16.msra.mxu3 %v1394_v37  ;;  %769 = vmatmul.bf16.vlgmr.msra.gmra.mxu0 %v354_v40 }
  0x2c   : > { %817 = vmatpush.bf16.msrb.mxu0 %v1409_v34  ;;  %783 = vmatmul.bf16.vlgmr.msra.gmra.mxu1 %v355_v43  ;;  %v1425_v43 = vld [vmem:[%s1756_s5 + $0x10] sm:$0xff] }
  0x2d   : > { %831 = vmatpush.bf16.msrb.mxu1 %v1417_v35  ;;  %797 = vmatmul.bf16.vlgmr.msra.gmra.mxu2 %v356_v47 }
  0x2e   : > { %852 = vmatpush.bf16.msrb.mxu2 %v1418_v44  ;;  %811 = vmatmul.bf16.vlgmr.msra.gmra.mxu3 %v357_v48  ;;  %v1424_v44 = vld [vmem:[%s1756_s5 + $0x8] sm:$0xff]  ;;  %v1441_v48 = vld [vmem:[%s1755_s4] ss:$0 sm:$0xff] }
  0x2f   : > { %906 = vmatpush.bf16.msrb.mxu3 %v1422_v6 }
  0x30   : > { %818 = vmatpush.bf16.msrb.mxu0 %v1408_v45  ;;  %v1423_v45 = vld [vmem:[%s1756_s5] sm:$0xff] }
  0x31   : > { %832 = vmatpush.bf16.msrb.mxu1 %v1416_v46  ;;  %v1430_v46 = vld [vmem:[%s1758_s7 + $0x18] sm:$0xff] }
  0x32   : > { %962 = vmatpush.bf16.msra.mxu2 %v1426_v14 }
  0x33   : > { %907 = vmatpush.bf16.msrb.mxu3 %v1421_v7 }
  0x34   : > { %819 = vmatpush.bf16.msrb.mxu0 %v1407_v49 }
  0x35   : > { %833 = vmatpush.bf16.msrb.mxu1 %v1415_v50 }
  0x36   : > { %963 = vmatpush.bf16.msra.mxu2 %v1425_v43 }
  0x37   : > { %908 = vmatpush.bf16.msrb.mxu3 %v1420_v8 }
  0x38   : > { %820 = vmatpush.bf16.msrb.mxu0 %v1406_v51 }
  0x39   : > { %834 = vmatpush.bf16.msrb.mxu1 %v1414_v52 }
  0x3a   : > { %964 = vmatpush.bf16.msra.mxu2 %v1424_v44 }
  0x3b   : > { %909 = vmatpush.bf16.msrb.mxu3 %v1419_v12 }
  0x3c   : > { %821 = vmatpush.bf16.msrb.mxu0 %v1405_v53 }
  0x3d   : > { %835 = vmatpush.bf16.msrb.mxu1 %v1413_v54  ;;  %1316 = vmatmul.msk.bf16.vlgmr.msrb.gmra.mxu2 %vm757_vm0, %v360_v59  ;;  %v1442_v59 = vld [vmem:[%s1757_s6] ss:$0 sm:$0xff] }
  0x3e   : > { %965 = vmatpush.bf16.msra.mxu2 %v1423_v45 }
  0x3f   : > { %1018 = vmatpush.bf16.msra.mxu3 %v1430_v46 }
  0x40   : > { %822 = vmatpush.bf16.msrb.mxu0 %v1404_v57  ;;  %v1427_v57 = vld [vmem:[%s1758_s7] sm:$0xff] }
  0x41   : > { %836 = vmatpush.bf16.msrb.mxu1 %v1412_v58 }
  0x43   : > { %1019 = vmatpush.bf16.msra.mxu3 %v1429_v55 }
  0x44   : > { %823 = vmatpush.bf16.msrb.mxu0 %v1403_v60 }
  0x45   : > { %837 = vmatpush.bf16.msrb.mxu1 %v1411_v61 }
  0x47   : > { %1020 = vmatpush.bf16.msra.mxu3 %v1428_v56 }
  0x48   : > { %824 = vmatpush.bf16.msrb.mxu0 %v1402_v62 }
  0x49   : > { %838 = vmatpush.bf16.msrb.mxu1 %v1410_v63 }
  0x4b   : > { %825 = vmatmul.bf16.vlgmr.msrb.gmra.mxu0 %v358_v4  ;;  %1021 = vmatpush.bf16.msra.mxu3 %v1427_v57 }
  0x4c   : > { %839 = vmatmul.bf16.vlgmr.msrb.gmra.mxu1 %v359_v5 }
  0xa8   : > { %v770_v9 = vpop.f32.mrf.mxu0 }
  0xa9   : > { %v784_v10 = vpop.f32.mrf.mxu1  ;;  %v771_v15 = vadd.f32 %v1440_v13, %v770_v9 }
  0xab   : > { %v785_v19 = vadd.f32 %v784_v10, %v771_v15 }
  0xb0   : > { %v798_v11 = vpop.f32.mrf.mxu2  ;;  %v772_v16 = vpop.f32.mrf.mxu0 }
  0xb1   : > { %v786_v17 = vpop.f32.mrf.mxu1  ;;  %v812_v20 = vpop.f32.mrf.mxu3  ;;  %v773_v21 = vadd.f32 %v1440_v13, %v772_v16  ;;  %v799_v22 = vadd.f32 %v798_v11, %v785_v19 }
  0xb3   : > { %v787_v23 = vadd.f32 %v786_v17, %v773_v21  ;;  %v813_v26 = vadd.f32 %v812_v20, %v799_v22 }
  0xb8   : > { %v800_v18 = vpop.f32.mrf.mxu2 }
  0xb9   : > { %v801_v28 = vadd.f32 %v800_v18, %v787_v23  ;;  %v814_v30 = vpop.f32.mrf.mxu3 }
  0xbb   : > { %v815_v31 = vadd.f32 %v814_v30, %v801_v28 }
  0xc0   : > { %v854_v27 = vpop.f32.mrf.mxu2 }
  0xc8   : > { %v826_v24 = vpop.f32.mrf.mxu0  ;;  %v856_v38 = vpop.f32.mrf.mxu2 }
  0xc9   : > { %v840_v25 = vpop.f32.mrf.mxu1  ;;  %v827_v29 = vadd.f32 %v826_v24, %v813_v26 }
  0xcb   : > { %v841_v32 = vadd.f32 %v840_v25, %v827_v29 }
  0xcd   : > { %v855_v36 = vadd.f32 %v854_v27, %v841_v32 }
  0xcf   : > { %v859_v40 = vmax.f32 %v855_v36, 0.0 }
  0xd0   : > { %v828_v33 = vpop.f32.mrf.mxu0 }
  0xd1   : > { %v829_v34 = vadd.f32 %v828_v33, %v815_v31  ;;  %v842_v35 = vpop.f32.mrf.mxu1 }
  0xd3   : > { %v843_v37 = vadd.f32 %v842_v35, %v829_v34 }
  0xd5   : > { %v857_v39 = vadd.f32 %v856_v38, %v843_v37 }
  0xd7   : > { %v860_v41 = vmax.f32 %v857_v39, 0.0 }
  0xd9   : > { %v861_v42 = vpack.c.bf16 %v860_v41, %v859_v40 }
  0xdb   : > { %1333 = vmatmul.msk.bf16.vlgmr.msrb.gmra.mxu3 %vm898_vm1, %v861_v42 }
 0x15e   : > { %v911_v47 = vpop.f32.mrf.mxu3 }
 0x15f   : > { %v912_v49 = vadd.f32 %v1441_v48, %v911_v47 }
 0x161   : > { %v916_v52 = vmax.f32 %v912_v49, 0.0 }
 0x166   : > { %v913_v50 = vpop.f32.mrf.mxu3 }
 0x167   : > { %v914_v51 = vadd.f32 %v1441_v48, %v913_v50 }
 0x169   : > { %v917_v53 = vmax.f32 %v914_v51, 0.0 }
 0x16b   : > { %v918_v54 = vpack.c.bf16 %v917_v53, %v916_v52 }
 0x16d   : > { %1350 = vmatmul.msk.bf16.vlgmr.msra.gmra.mxu2 %vm898_vm1, %v918_v54 }
 0x1f0   : > { %v967_v58 = vpop.f32.mrf.mxu2 }
 0x1f1   : > { %v968_v60 = vadd.f32 %v1442_v59, %v967_v58 }
 0x1f3   : > { %v972_v63 = vmax.f32 %v968_v60, 0.0 }
 0x1f8   : > { %v969_v61 = vpop.f32.mrf.mxu2 }
 0x1f9   : > { %v970_v62 = vadd.f32 %v1442_v59, %v969_v61 }
 0x1fb   : > { %v973_v0 = vmax.f32 %v970_v62, 0.0 }
 0x1fd   : > { %v974_v1 = vpack.c.bf16 %v973_v0, %v972_v63 }
 0x1ff   : > { %1367 = vmatmul.msk.bf16.vlgmr.msra.gmra.mxu3 %vm898_vm1, %v974_v1 }
 0x282   : > { %v1023_v3 = vpop.f32.mrf.mxu3 }
 0x283   : > { %v1024_v4 = vadd.f32 %v1443_v2, %v1023_v3 }
 0x285   : > { %v1029_v5 = vsel %vm1028_vm2, %v1024_v4, -inf }
 0x286   : > { %1030 = vmax.xlane.f32.xlu0 %v1029_v5 }
 0x28a   : > { %v1025_v6 = vpop.f32.mrf.mxu3 }
 0x28b   : > { %v1026_v7 = vadd.f32 %v1443_v2, %v1025_v6 }
 0x28d   : > { %v1032_v8 = vsel %vm1028_vm2, %v1026_v7, -inf }
 0x28e   : > { %1033 = vmax.xlane.f32.xlu0 %v1032_v8 }
 0x2f9   : > { %v1031_v9 = vpop.xlane.xlu0 %1030 }
 0x2fa   : > { %v1035_v10 = vsub.f32 %v1024_v4, %v1031_v9 }
 0x2fc   : > { %v1037_v11 = vmul.f32 1.442695, %v1035_v10 }
 0x2fe   : > { %1444 = vpow2.f32 %v1037_v11 }
 0x301   : > { %v1034_v12 = vpop.xlane.xlu0 %1033 }
 0x302   : > { %v1036_v13 = vsub.f32 %v1026_v7, %v1034_v12 }
 0x304   : > { %v1445_v14 = vpop.eup %1444  ;;  %v1039_v15 = vmul.f32 1.442695, %v1036_v13 }
 0x305   : > { %v1041_v16 = vsel %vm1028_vm2, %v1445_v14, 0.0 }
 0x306   : > { %1446 = vpow2.f32 %v1039_v15  ;;  %1042 = vadd.xlane.f32.xlu1 %v1041_v16 }
 0x30c   : > { %v1447_v17 = vpop.eup %1446 }
 0x30d   : > { %v1044_v18 = vsel %vm1028_vm2, %v1447_v17, 0.0 }
 0x30e   : > { %1045 = vadd.xlane.f32.xlu1 %v1044_v18 }
 0x379   : > { %v1043_v19 = vpop.xlane.xlu1 %1042 }
 0x37a   : > { %1448 = vlog2.f32 %v1043_v19 }
 0x380   : > { %v1449_v20 = vpop.eup %1448 }
 0x381   : > { %v1048_v21 = vmul.f32 0.6931472, %v1449_v20  ;;  %v1046_v22 = vpop.xlane.xlu1 %1045 }
 0x382   : > { %1450 = vlog2.f32 %v1046_v22 }
 0x383   : > { %v1051_v23 = vsub.f32 %v1035_v10, %v1048_v21 }
 0x385   : > { %1053 = vst.msk [vmem:[%s337_s18] sm:$0xff] %vm1028_vm2, %v1051_v23 }
 0x388   : > { %v1451_v24 = vpop.eup %1450 }
 0x389   : > { %v1050_v25 = vmul.f32 0.6931472, %v1451_v24 }
 0x38b   : > { %v1052_v26 = vsub.f32 %v1036_v13, %v1050_v25 }
 0x38d   : > { %1054 = vst.msk [vmem:[%s337_s18 + $0x8] sm:$0xff] %vm1028_vm2, %v1052_v26 }
 0x38e PF: > { %s19_s30 = sadd.s32 1, %s1458_s30  }
 0x38f   : > { %p16_p4 = scmp.ge.s32.totalorder %s19_s30, 4  }
 0x391   :  { %18 = sbr.rel (!%p16_p4) target bundleno = 1 (0x1), region = 86 }

</bundles_post_ra>
